<compile_context>
chip_gen: v7x
topology: tpu7x:2x2x1
jax: 0.10.0
libtpu: 0.0.40
codegen_flags: <defaults>
</compile_context>

<pallas_src>
import functools

import jax
import jax.numpy as jnp
from jax.experimental import pallas as pl
from jax.experimental.pallas import tpu as pltpu


def _bot_kernel(rel_ref, seed_ref,                          # scalar prefetch (SMEM)
                word_ref, ent_ref, mem_ref, tgt_ref,        # (TB, ·) row blocks
                w_word_ref, w_ent_ref, w_mem_ref, w_tgt_ref,  # (·, SD) weight row-blocks
                b1_ref,                                      # (1, SD)
                w2_ref, b2_ref,                              # (SD, 7), (1, 7) rel-selected
                outp_ref, prob_ref,                          # (TB, SD), (TB, 7)
                *, training):
    del rel_ref                                              # used only by index_maps

    # hid2state: 4 partial GEMMs (one per input chunk) + bias, then tanh.
    acc = jnp.dot(word_ref[...], w_word_ref[...], preferred_element_type=jnp.float32)
    acc += jnp.dot(ent_ref[...], w_ent_ref[...], preferred_element_type=jnp.float32)
    acc += jnp.dot(mem_ref[...], w_mem_ref[...], preferred_element_type=jnp.float32)
    acc += jnp.dot(tgt_ref[...], w_tgt_ref[...], preferred_element_type=jnp.float32)
    h = jnp.tanh(acc + b1_ref[...])                          # (TB, SD) f32

    if training:
        # F.dropout(p=0.5, training=True): keep w.p. 0.5, scale by 2.
        # NOTE: hardware PRNG stream differs from torch; semantics match.
        pltpu.prng_seed(seed_ref[0] + pl.program_id(0))
        bits = pltpu.bitcast(pltpu.prng_random_bits(h.shape), jnp.uint32)
        keep = bits < jnp.uint32(0x80000000)
        h = jnp.where(keep, h * 2.0, jnp.zeros_like(h))

    # state2probL[rel - 1] + softmax over 7 logits (exact normalization).
    logits = jnp.dot(h, w2_ref[...], preferred_element_type=jnp.float32) + b2_ref[...]
    m = jnp.max(logits, axis=-1, keepdims=True)
    e = jnp.exp(logits - m)
    prob = e / jnp.sum(e, axis=-1, keepdims=True)

    outp_ref[...] = h
    prob_ref[...] = prob


def _choose_tb(B):
    """Batch block: large to amortize per-step overhead; >=2 grid steps when possible."""
    if B <= 8:
        return B                       # block dim == full array dim (always legal)
    tb = -(-B // 2)                    # aim for >=2 grid steps (v7x megacore split)
    tb = ((tb + 7) // 8) * 8           # sublane aligned
    return min(tb, 1024)               # VMEM-safe cap on v5e/v6e/v7x


def _forward_impl(params, word, ent, mem, tgt, rel_idx, seed_arr, training):
    w_word, w_ent, w_mem, w_tgt, b1, w2, b2 = params
    B = word.shape[0]
    SD = b1.shape[-1]
    DW, DE, DM, DT = word.shape[1], ent.shape[1], mem.shape[1], tgt.shape[1]
    in_feat = DW + DE + DM + DT

    TB = _choose_tb(B)
    grid = (pl.cdiv(B, TB),)

    # Advisory cost hint for XLA scheduling around the custom call.
    cost = pl.CostEstimate(
        flops=2 * B * (in_feat * SD + SD * 7),
        transcendentals=B * (SD + 7),
        bytes_accessed=4 * (B * (in_feat + SD + 7) + in_feat * SD + SD + SD * 7 + 7))

    # Explicit VMEM budget: double-buffered tiles + weights + headroom, clamped
    # to [16 MiB (v5e scoped default), 48 MiB (< v7x 64 MiB physical)].
    need = (2 * TB * 4 * (in_feat + SD + 7)
            + 2 * 4 * (in_feat * SD + SD + SD * 7 + 7) + (2 << 20))
    vmem_limit = int(min(max(need, 16 << 20), 48 << 20))

    kernel = functools.partial(_bot_kernel, training=training)

    outp, prob = pl.pallas_call(
        kernel,
        out_shape=(jax.ShapeDtypeStruct((B, SD), jnp.float32),
                   jax.ShapeDtypeStruct((B, 7), jnp.float32)),
        grid_spec=pltpu.PrefetchScalarGridSpec(
            num_scalar_prefetch=2,              # rel-1, seed -> SMEM
            grid=grid,
            in_specs=[
                pl.BlockSpec((TB, DW), lambda i, r, s: (i, 0)),
                pl.BlockSpec((TB, DE), lambda i, r, s: (i, 0)),
                pl.BlockSpec((TB, DM), lambda i, r, s: (i, 0)),
                pl.BlockSpec((TB, DT), lambda i, r, s: (i, 0)),
                pl.BlockSpec((DW, SD), lambda i, r, s: (0, 0)),
                pl.BlockSpec((DE, SD), lambda i, r, s: (0, 0)),
                pl.BlockSpec((DM, SD), lambda i, r, s: (0, 0)),
                pl.BlockSpec((DT, SD), lambda i, r, s: (0, 0)),
                pl.BlockSpec((1, SD), lambda i, r, s: (0, 0)),
                # head selection: leading axis index from rel-1, squeezed away
                pl.BlockSpec((pl.Squeezed(), SD, 7), lambda i, r, s: (r[0], 0, 0)),
                pl.BlockSpec((pl.Squeezed(), 1, 7), lambda i, r, s: (r[0], 0, 0)),
            ],
            out_specs=[
                pl.BlockSpec((TB, SD), lambda i, r, s: (i, 0)),
                pl.BlockSpec((TB, 7), lambda i, r, s: (i, 0)),
            ],
        ),
        compiler_params=pltpu.CompilerParams(
            dimension_semantics=("parallel",),
            vmem_limit_bytes=vmem_limit),
        cost_estimate=cost,
    )(rel_idx, seed_arr, word, ent, mem, tgt,
      w_word, w_ent, w_mem, w_tgt, b1, w2, b2)
    return outp, prob


@functools.partial(jax.jit, static_argnames=("training",))
def bot_model_forward_batched(params, ent_vec, bot_word_vec, memory, target,
                              rel, seed=0, *, training=False):
    """Batched forward: each tensor has a leading batch dim; one shared 1-based rel."""
    rel_idx = (jnp.asarray(rel, jnp.int32) - 1).reshape(1)
    seed_arr = jnp.asarray(seed, jnp.int32).reshape(1)
    return _forward_impl(params,
                         bot_word_vec.astype(jnp.float32),
                         ent_vec.astype(jnp.float32),
                         memory.astype(jnp.float32),
                         target.astype(jnp.float32),
                         rel_idx, seed_arr, training)


@functools.partial(jax.jit, static_argnames=("training",))
def bot_model_forward(params, ent_vec, bot_word_vec, memory, target, rel,
                      seed=0, *, training=False):
    """Single-example forward matching BotModel.forward (rel is 1-based)."""
    rel_idx = (jnp.asarray(rel, jnp.int32) - 1).reshape(1)
    seed_arr = jnp.asarray(seed, jnp.int32).reshape(1)
    outp, prob = _forward_impl(params,
                               bot_word_vec.astype(jnp.float32)[None, :],
                               ent_vec.astype(jnp.float32)[None, :],
                               memory.astype(jnp.float32)[None, :],
                               target.astype(jnp.float32)[None, :],
                               rel_idx, seed_arr, training)
    return outp[0], prob[0]


def init_params(key, dim, statedim, rel_count):
    """torch.nn.Linear-style init (uniform +-1/sqrt(fan_in)).

    hid2state weight is split into row blocks matching the forward's input order
    [bot_word_vec (2*dim), ent_vec (dim), memory (SD), target (SD)].
    """
    in_feat = dim * 3 + statedim * 2
    k1, k2, k3, k4 = jax.random.split(key, 4)
    bnd1 = 1.0 / jnp.sqrt(in_feat)
    w1 = jax.random.uniform(k1, (in_feat, statedim), jnp.float32, -bnd1, bnd1)
    b1 = jax.random.uniform(k2, (statedim,), jnp.float32, -bnd1, bnd1)
    bnd2 = 1.0 / jnp.sqrt(statedim)
    w2 = jax.random.uniform(k3, (rel_count, statedim, 7), jnp.float32, -bnd2, bnd2)
    b2 = jax.random.uniform(k4, (rel_count, 7), jnp.float32, -bnd2, bnd2)
    o1, o2, o3 = 2 * dim, 3 * dim, 3 * dim + statedim
    return (w1[:o1], w1[o1:o2], w1[o2:o3], w1[o3:],
            b1[None, :], w2, b2[:, None, :])


def reference_forward(params, ent_vec, bot_word_vec, memory, target, rel):
    """Pure-JAX reference (training=False path), single example."""
    w_word, w_ent, w_mem, w_tgt, b1, w2, b2 = params
    w1 = jnp.concatenate([w_word, w_ent, w_mem, w_tgt], axis=0)
    inp = jnp.concatenate([bot_word_vec, ent_vec, memory, target])
    h = jnp.tanh(jnp.dot(inp, w1, precision=jax.lax.Precision.HIGHEST) + b1[0])
    logits = jnp.dot(h, w2[rel - 1], precision=jax.lax.Precision.HIGHEST) + b2[rel - 1, 0]
    return h, jax.nn.softmax(logits, axis=0)


if __name__ == "__main__":
    dim, statedim, rel_count = 8, 16, 4
    rel = 2
    B = 8

    key = jax.random.PRNGKey(0)
    kp, k_ent, k_word, k_mem, k_tgt = jax.random.split(key, 5)

    params = init_params(kp, dim, statedim, rel_count)

    ent_vec = jax.random.normal(k_ent, (B, dim), jnp.float32)
    bot_word_vec = jax.random.normal(k_word, (B, 2 * dim), jnp.float32)
    memory = jax.random.normal(k_mem, (B, statedim), jnp.float32)
    target = jax.random.normal(k_tgt, (B, statedim), jnp.float32)

    # Batched path: B rows through a single pallas_call.
    outp_b, prob_b = bot_model_forward_batched(
        params, ent_vec, bot_word_vec, memory, target, rel, training=False)
    outp_b = jax.block_until_ready(outp_b)
    prob_b = jax.block_until_ready(prob_b)
    assert outp_b.shape == (B, statedim) and prob_b.shape == (B, 7)

    for b in range(B):
        ref_o, ref_p = reference_forward(params, ent_vec[b], bot_word_vec[b],
                                         memory[b], target[b], rel)
        assert jnp.allclose(outp_b[b], ref_o, atol=2e-4), "outp mismatch (batched)"
        assert jnp.allclose(prob_b[b], ref_p, atol=2e-4), "prob mismatch (batched)"
        assert jnp.allclose(jnp.sum(prob_b[b]), 1.0, atol=1e-4), "softmax not normalized"

    # Single-example path (exact BotModel.forward semantics).
    outp1, prob1 = bot_model_forward(params, ent_vec[0], bot_word_vec[0],
                                     memory[0], target[0], rel, training=False)
    outp1 = jax.block_until_ready(outp1)
    prob1 = jax.block_until_ready(prob1)
    ref_o, ref_p = reference_forward(params, ent_vec[0], bot_word_vec[0],
                                     memory[0], target[0], rel)
    assert outp1.shape == (statedim,) and prob1.shape == (7,)
    assert jnp.allclose(outp1, ref_o, atol=2e-4), "outp mismatch (single)"
    assert jnp.allclose(prob1, ref_p, atol=2e-4), "prob mismatch (single)"
    assert jnp.allclose(jnp.sum(prob1), 1.0, atol=1e-4), "softmax not normalized (single)"

    print("KERNEL_OK")
</pallas_src>

<mosaic_0001>
module attributes {stable_mosaic.version = 11 : i64} {
  func.func @_bot_kernel(%arg0: i32, %arg1: memref<1xi32, #tpu.memory_space<smem>>, %arg2: memref<1xi32, #tpu.memory_space<smem>>, %arg3: memref<8x16xf32, #tpu.memory_space<vmem>>, %arg4: memref<8x8xf32, #tpu.memory_space<vmem>>, %arg5: memref<8x16xf32, #tpu.memory_space<vmem>>, %arg6: memref<8x16xf32, #tpu.memory_space<vmem>>, %arg7: memref<16x16xf32, #tpu.memory_space<vmem>>, %arg8: memref<8x16xf32, #tpu.memory_space<vmem>>, %arg9: memref<16x16xf32, #tpu.memory_space<vmem>>, %arg10: memref<16x16xf32, #tpu.memory_space<vmem>>, %arg11: memref<1x16xf32, #tpu.memory_space<vmem>>, %arg12: memref<1x16x7xf32, #tpu.memory_space<vmem>>, %arg13: memref<1x1x7xf32, #tpu.memory_space<vmem>>, %arg14: memref<8x16xf32, #tpu.memory_space<vmem>>, %arg15: memref<8x7xf32, #tpu.memory_space<vmem>>) attributes {dimension_semantics = [#tpu.dimension_semantics<parallel>], iteration_bounds = array<i64: 1>, scalar_prefetch = 2 : i64, scratch_operands = 0 : i64, tpu.core_type = #tpu.core_type<tc>, window_params = [{transform_indices = @transform_0, window_bounds = array<i64: 8, 16>}, {transform_indices = @transform_1, window_bounds = array<i64: 8, 8>}, {transform_indices = @transform_2, window_bounds = array<i64: 8, 16>}, {transform_indices = @transform_3, window_bounds = array<i64: 8, 16>}, {pipeline_mode = #tpu.pipeline_mode<synchronous>, transform_indices = @transform_4, window_bounds = array<i64: 16, 16>}, {pipeline_mode = #tpu.pipeline_mode<synchronous>, transform_indices = @transform_5, window_bounds = array<i64: 8, 16>}, {pipeline_mode = #tpu.pipeline_mode<synchronous>, transform_indices = @transform_6, window_bounds = array<i64: 16, 16>}, {pipeline_mode = #tpu.pipeline_mode<synchronous>, transform_indices = @transform_7, window_bounds = array<i64: 16, 16>}, {pipeline_mode = #tpu.pipeline_mode<synchronous>, transform_indices = @transform_8, window_bounds = array<i64: 1, 16>}, {transform_indices = @transform_9, window_bounds = array<i64: 1, 16, 7>}, {transform_indices = @transform_10, window_bounds = array<i64: 1, 1, 7>}, {transform_indices = @transform_11, window_bounds = array<i64: 8, 16>}, {transform_indices = @transform_12, window_bounds = array<i64: 8, 7>}]} {
    %c0 = arith.constant 0 : index
    %c0_0 = arith.constant 0 : index
    %0 = vector.load %arg3[%c0, %c0_0] : memref<8x16xf32, #tpu.memory_space<vmem>>, vector<8x16xf32>
    %c0_1 = arith.constant 0 : index
    %c0_2 = arith.constant 0 : index
    %1 = vector.load %arg7[%c0_1, %c0_2] : memref<16x16xf32, #tpu.memory_space<vmem>>, vector<16x16xf32>
    %cst = arith.constant dense<0.000000e+00> : vector<8x16xf32>
    %2 = tpu.matmul %0, %1, %cst {dimension_numbers = #tpu.dot_dimension_numbers<[1], [0], [0], [1], [0, 0, 1, 1], [], []>} : vector<8x16xf32>, vector<16x16xf32>, vector<8x16xf32> -> vector<8x16xf32>
    %c0_3 = arith.constant 0 : index
    %c0_4 = arith.constant 0 : index
    %3 = vector.load %arg4[%c0_3, %c0_4] : memref<8x8xf32, #tpu.memory_space<vmem>>, vector<8x8xf32>
    %c0_5 = arith.constant 0 : index
    %c0_6 = arith.constant 0 : index
    %4 = vector.load %arg8[%c0_5, %c0_6] : memref<8x16xf32, #tpu.memory_space<vmem>>, vector<8x16xf32>
    %cst_7 = arith.constant dense<0.000000e+00> : vector<8x16xf32>
    %5 = tpu.matmul %3, %4, %cst_7 {dimension_numbers = #tpu.dot_dimension_numbers<[1], [0], [0], [1], [0, 0, 1, 1], [], []>} : vector<8x8xf32>, vector<8x16xf32>, vector<8x16xf32> -> vector<8x16xf32>
    %6 = arith.addf %2, %5 : vector<8x16xf32>
    %c0_8 = arith.constant 0 : index
    %c0_9 = arith.constant 0 : index
    %7 = vector.load %arg5[%c0_8, %c0_9] : memref<8x16xf32, #tpu.memory_space<vmem>>, vector<8x16xf32>
    %c0_10 = arith.constant 0 : index
    %c0_11 = arith.constant 0 : index
    %8 = vector.load %arg9[%c0_10, %c0_11] : memref<16x16xf32, #tpu.memory_space<vmem>>, vector<16x16xf32>
    %cst_12 = arith.constant dense<0.000000e+00> : vector<8x16xf32>
    %9 = tpu.matmul %7, %8, %cst_12 {dimension_numbers = #tpu.dot_dimension_numbers<[1], [0], [0], [1], [0, 0, 1, 1], [], []>} : vector<8x16xf32>, vector<16x16xf32>, vector<8x16xf32> -> vector<8x16xf32>
    %10 = arith.addf %6, %9 : vector<8x16xf32>
    %c0_13 = arith.constant 0 : index
    %c0_14 = arith.constant 0 : index
    %11 = vector.load %arg6[%c0_13, %c0_14] : memref<8x16xf32, #tpu.memory_space<vmem>>, vector<8x16xf32>
    %c0_15 = arith.constant 0 : index
    %c0_16 = arith.constant 0 : index
    %12 = vector.load %arg10[%c0_15, %c0_16] : memref<16x16xf32, #tpu.memory_space<vmem>>, vector<16x16xf32>
    %cst_17 = arith.constant dense<0.000000e+00> : vector<8x16xf32>
    %13 = tpu.matmul %11, %12, %cst_17 {dimension_numbers = #tpu.dot_dimension_numbers<[1], [0], [0], [1], [0, 0, 1, 1], [], []>} : vector<8x16xf32>, vector<16x16xf32>, vector<8x16xf32> -> vector<8x16xf32>
    %14 = arith.addf %10, %13 : vector<8x16xf32>
    %c0_18 = arith.constant 0 : index
    %c0_19 = arith.constant 0 : index
    %15 = vector.load %arg11[%c0_18, %c0_19] : memref<1x16xf32, #tpu.memory_space<vmem>>, vector<1x16xf32>
    %16 = vector.broadcast %15 : vector<1x16xf32> to vector<8x16xf32>
    %17 = arith.addf %14, %16 : vector<8x16xf32>
    %18 = math.tanh %17 : vector<8x16xf32>
    %c0_20 = arith.constant 0 : index
    %c0_21 = arith.constant 0 : index
    %c0_22 = arith.constant 0 : index
    %19 = vector.load %arg12[%c0_20, %c0_21, %c0_22] : memref<1x16x7xf32, #tpu.memory_space<vmem>>, vector<1x16x7xf32>
    %20 = vector.shape_cast %19 : vector<1x16x7xf32> to vector<16x7xf32>
    %cst_23 = arith.constant dense<0.000000e+00> : vector<8x7xf32>
    %21 = tpu.matmul %18, %20, %cst_23 {dimension_numbers = #tpu.dot_dimension_numbers<[1], [0], [0], [1], [0, 0, 1, 1], [], []>} : vector<8x16xf32>, vector<16x7xf32>, vector<8x7xf32> -> vector<8x7xf32>
    %c0_24 = arith.constant 0 : index
    %c0_25 = arith.constant 0 : index
    %c0_26 = arith.constant 0 : index
    %22 = vector.load %arg13[%c0_24, %c0_25, %c0_26] : memref<1x1x7xf32, #tpu.memory_space<vmem>>, vector<1x1x7xf32>
    %23 = vector.shape_cast %22 : vector<1x1x7xf32> to vector<1x7xf32>
    %24 = vector.broadcast %23 : vector<1x7xf32> to vector<8x7xf32>
    %25 = arith.addf %21, %24 : vector<8x7xf32>
    %cst_27 = arith.constant dense<0xFF800000> : vector<8xf32>
    %26 = vector.multi_reduction <maximumf>, %25, %cst_27 [1] : vector<8x7xf32> to vector<8xf32>
    %27 = vector.shape_cast %26 : vector<8xf32> to vector<8x1xf32>
    %28 = vector.broadcast %27 : vector<8x1xf32> to vector<8x7xf32>
    %29 = arith.subf %25, %28 : vector<8x7xf32>
    %30 = math.exp %29 : vector<8x7xf32>
    %cst_28 = arith.constant dense<0.000000e+00> : vector<8xf32>
    %31 = vector.multi_reduction <add>, %30, %cst_28 [1] : vector<8x7xf32> to vector<8xf32>
    %32 = vector.shape_cast %31 : vector<8xf32> to vector<8x1xf32>
    %33 = vector.broadcast %32 : vector<8x1xf32> to vector<8x7xf32>
    %34 = arith.divf %30, %33 : vector<8x7xf32>
    %c0_29 = arith.constant 0 : index
    %c0_30 = arith.constant 0 : index
    %35 = vector.load %arg14[%c0_29, %c0_30] : memref<8x16xf32, #tpu.memory_space<vmem>>, vector<8x16xf32>
    tpu.vector_store %arg14[%c0_29, %c0_30], %18 {strides = array<i32>} : memref<8x16xf32, #tpu.memory_space<vmem>>, vector<8x16xf32>,
    %c0_31 = arith.constant 0 : index
    %c0_32 = arith.constant 0 : index
    %36 = vector.load %arg15[%c0_31, %c0_32] : memref<8x7xf32, #tpu.memory_space<vmem>>, vector<8x7xf32>
    tpu.vector_store %arg15[%c0_31, %c0_32], %34 {strides = array<i32>} : memref<8x7xf32, #tpu.memory_space<vmem>>, vector<8x7xf32>,
    return
  }
  func.func @transform_0(%arg0: i32, %arg1: memref<1xi32, #tpu.memory_space<smem>>, %arg2: memref<1xi32, #tpu.memory_space<smem>>) -> (i32, i32) {
    %c0_i32 = arith.constant 0 : i32
    %c0_i32_0 = arith.constant 0 : i32
    return %arg0, %c0_i32 : i32, i32
  }
  func.func @transform_1(%arg0: i32, %arg1: memref<1xi32, #tpu.memory_space<smem>>, %arg2: memref<1xi32, #tpu.memory_space<smem>>) -> (i32, i32) {
    %c0_i32 = arith.constant 0 : i32
    %c0_i32_0 = arith.constant 0 : i32
    return %arg0, %c0_i32 : i32, i32
  }
  func.func @transform_2(%arg0: i32, %arg1: memref<1xi32, #tpu.memory_space<smem>>, %arg2: memref<1xi32, #tpu.memory_space<smem>>) -> (i32, i32) {
    %c0_i32 = arith.constant 0 : i32
    %c0_i32_0 = arith.constant 0 : i32
    return %arg0, %c0_i32 : i32, i32
  }
  func.func @transform_3(%arg0: i32, %arg1: memref<1xi32, #tpu.memory_space<smem>>, %arg2: memref<1xi32, #tpu.memory_space<smem>>) -> (i32, i32) {
    %c0_i32 = arith.constant 0 : i32
    %c0_i32_0 = arith.constant 0 : i32
    return %arg0, %c0_i32 : i32, i32
  }
  func.func @transform_4(%arg0: i32, %arg1: memref<1xi32, #tpu.memory_space<smem>>, %arg2: memref<1xi32, #tpu.memory_space<smem>>) -> (i32, i32) {
    %c0_i32 = arith.constant 0 : i32
    %c0_i32_0 = arith.constant 0 : i32
    %c0_i32_1 = arith.constant 0 : i32
    return %c0_i32, %c0_i32_0 : i32, i32
  }
  func.func @transform_5(%arg0: i32, %arg1: memref<1xi32, #tpu.memory_space<smem>>, %arg2: memref<1xi32, #tpu.memory_space<smem>>) -> (i32, i32) {
    %c0_i32 = arith.constant 0 : i32
    %c0_i32_0 = arith.constant 0 : i32
    %c0_i32_1 = arith.constant 0 : i32
    return %c0_i32, %c0_i32_0 : i32, i32
  }
  func.func @transform_6(%arg0: i32, %arg1: memref<1xi32, #tpu.memory_space<smem>>, %arg2: memref<1xi32, #tpu.memory_space<smem>>) -> (i32, i32) {
    %c0_i32 = arith.constant 0 : i32
    %c0_i32_0 = arith.constant 0 : i32
    %c0_i32_1 = arith.constant 0 : i32
    return %c0_i32, %c0_i32_0 : i32, i32
  }
  func.func @transform_7(%arg0: i32, %arg1: memref<1xi32, #tpu.memory_space<smem>>, %arg2: memref<1xi32, #tpu.memory_space<smem>>) -> (i32, i32) {
    %c0_i32 = arith.constant 0 : i32
    %c0_i32_0 = arith.constant 0 : i32
    %c0_i32_1 = arith.constant 0 : i32
    return %c0_i32, %c0_i32_0 : i32, i32
  }
  func.func @transform_8(%arg0: i32, %arg1: memref<1xi32, #tpu.memory_space<smem>>, %arg2: memref<1xi32, #tpu.memory_space<smem>>) -> (i32, i32) {
    %c0_i32 = arith.constant 0 : i32
    %c0_i32_0 = arith.constant 0 : i32
    %c0_i32_1 = arith.constant 0 : i32
    return %c0_i32, %c0_i32_0 : i32, i32
  }
  func.func @transform_9(%arg0: i32, %arg1: memref<1xi32, #tpu.memory_space<smem>>, %arg2: memref<1xi32, #tpu.memory_space<smem>>) -> (i32, i32, i32) {
    %c0 = arith.constant 0 : index
    %0 = memref.load %arg1[%c0] : memref<1xi32, #tpu.memory_space<smem>>
    %c0_i32 = arith.constant 0 : i32
    %c0_i32_0 = arith.constant 0 : i32
    %c0_i32_1 = arith.constant 0 : i32
    return %0, %c0_i32, %c0_i32_0 : i32, i32, i32
  }
  func.func @transform_10(%arg0: i32, %arg1: memref<1xi32, #tpu.memory_space<smem>>, %arg2: memref<1xi32, #tpu.memory_space<smem>>) -> (i32, i32, i32) {
    %c0 = arith.constant 0 : index
    %0 = memref.load %arg1[%c0] : memref<1xi32, #tpu.memory_space<smem>>
    %c0_i32 = arith.constant 0 : i32
    %c0_i32_0 = arith.constant 0 : i32
    %c0_i32_1 = arith.constant 0 : i32
    return %0, %c0_i32, %c0_i32_0 : i32, i32, i32
  }
  func.func @transform_11(%arg0: i32, %arg1: memref<1xi32, #tpu.memory_space<smem>>, %arg2: memref<1xi32, #tpu.memory_space<smem>>) -> (i32, i32) {
    %c0_i32 = arith.constant 0 : i32
    %c0_i32_0 = arith.constant 0 : i32
    return %arg0, %c0_i32 : i32, i32
  }
  func.func @transform_12(%arg0: i32, %arg1: memref<1xi32, #tpu.memory_space<smem>>, %arg2: memref<1xi32, #tpu.memory_space<smem>>) -> (i32, i32) {
    %c0_i32 = arith.constant 0 : i32
    %c0_i32_0 = arith.constant 0 : i32
    return %arg0, %c0_i32 : i32, i32
  }
}

</mosaic_0001>

<bundles_post_ra>
// kernel: bot_model_forward_batched.1
= control target key start
LH: loop header
LB: loop body
LE: loop exit
PB: predicated region body
PF: predicated region fallthrough
CT: control target
= control target key end

     0   :  { %22 = vsyncpa [#allocation6], 0  ;;  %v657_v3 = vmov 0.0   ;;  %v658_v4 = vmov 0.0|0.0   ;;  %vm85_vm0 = vcmask 64512   ;;  %vm659_vm1 = vmmov 0   ;;  %s822_s0 = inlined_call_operand.<no memory space> [shape: s32[1], index: 0, kind: input, shape index: {}]   ;;  %s823_s1 = inlined_call_operand.<no memory space> [shape: s32[1], index: 1, kind: input, shape index: {}]   ;;  %s824_s2 = inlined_call_operand.vmem [shape: f32[8,16], index: 2, kind: input, shape index: {}]   ;;  %s825_s3 = inlined_call_operand.vmem [shape: f32[8,8], index: 3, kind: input, shape index: {}]   ;;  %s826_s4 = inlined_call_operand.vmem [shape: f32[8,16], index: 4, kind: input, shape index: {}]   ;;  %s827_s5 = inlined_call_operand.vmem [shape: f32[8,16], index: 5, kind: input, shape index: {}]   ;;  %s828_s6 = inlined_call_operand.vmem [shape: f32[16,16], index: 6, kind: input, shape index: {}]   ;;  %s829_s7 = inlined_call_operand.vmem [shape: f32[8,16], index: 7, kind: input, shape index: {}]   ;;  %s830_s8 = inlined_call_operand.vmem [shape: f32[16,16], index: 8, kind: input, shape index: {}]   ;;  %s831_s9 = inlined_call_operand.vmem [shape: f32[16,16], index: 9, kind: input, shape index: {}]   ;;  %s832_s10 = inlined_call_operand.vmem [shape: f32[1,16], index: 10, kind: input, shape index: {}]   ;;  %s833_s11 = inlined_call_operand.vmem [shape: f32[4,16,7], index: 11, kind: input, shape index: {}]   ;;  %s834_s12 = inlined_call_operand.vmem [shape: f32[4,1,7], index: 12, kind: input, shape index: {}]   ;;  %s835_s13 = inlined_call_operand.hbm [shape: f32[8,16], index: 13, kind: output, shape index: {0}]   ;;  %s836_s14 = inlined_call_operand.hbm [shape: f32[8,7], index: 14, kind: output, shape index: {1}]  }
   0x1   :  { %v84_v0 = vld [vmem:[%s829_s7] sm:$0xff]  ;;  %v82_v2 = vld [vmem:[%s828_s6 + $0x8] sm:$0xff]  ;;  %553 = vmatprep.subr.mxu0 %v657_v3  ;;  %586 = vmatprep.subr.bf16.mxu1 %v658_v4  ;;  %vm159_vm2 = vcmask 130048  }
   0x2   :  { %v81_v1 = vld [vmem:[%s828_s6] sm:$0xff]  ;;  %v235_v8 = vld [vmem:[%s830_s8 + $0x8] sm:$0xff]  ;;  %554 = vmatpush3.msra.mxu0 %v84_v0  ;;  %555 = vmatprep.mubr.msk.f32.mxu0 %vm659_vm1, %v657_v3 }
   0x3   :  { %v587_v5 = vpack.c.bf16 %v82_v2, %v81_v1  ;;  %v83_v6 = vld [vmem:[%s825_s3] sm:$0xff]  ;;  %v312_v11 = vld [vmem:[%s831_s9 + $0x8] sm:$0xff] }
   0x4   :  { %v234_v7 = vld [vmem:[%s830_s8] sm:$0xff]  ;;  %556 = vmatmul.mubr.msk.f32.vlgmr.msra.gmra.mrb[0].mxu0 %vm85_vm0, %v83_v6 }
   0x5   :  { %v590_v9 = vpack.c.bf16 %v235_v8, %v234_v7  ;;  %v311_v10 = vld [vmem:[%s831_s9] sm:$0xff]  ;;  %588 = vmatpush3.bf16.msra.mxu1 %v587_v5 }
   0x6   :  { %v80_v12 = vld [vmem:[%s824_s2] sm:$0xff]  ;;  %v593_v13 = vpack.c.bf16 %v312_v11, %v311_v10 }
   0x7   :  { %23 = vsyncpa [#allocation8], 0  ;;  %589 = vmatprep.subr.bf16.mxu0 %v658_v4  ;;  %562 = vmatprep.mubr.msk.f32.mxu1 %vm659_vm1, %v657_v3  ;;  %v233_v14 = vld [vmem:[%s826_s4] sm:$0xff]  ;;  %p69_p0 = scmp.lt.s32.totalorder %s822_s0, 3  ;;  %vm478_vm3 = vcmask 56320  }
   0x8   :  { %591 = vmatpush3.bf16.msra.mxu0 %v590_v9  ;;  %592 = vmatprep.subr.bf16.mxu1 %v658_v4  ;;  %v310_v15 = vld [vmem:[%s827_s5] sm:$0xff] }
   0x9   :  { %563 = vmatmul.mubr.msk.f32.vlgmr.msra.gmra.mrb[0].mxu1 %vm159_vm2, %v80_v12  ;;  %569 = vmatprep.mubr.msk.f32.mxu0 %vm659_vm1, %v657_v3  ;;  %s838_s0 = smov (!%p69_p0, %s822_s0), 3  ;;  %v535_v28 = vld [vmem:[%s832_s10] ss:$0 sm:$0xff]  ;;  %s660_s10 = smov [#allocation5]  }
   0xa   :  { %594 = vmatpush3.bf16.msra.mxu1 %v593_v13  ;;  %576 = vmatprep.mubr.msk.f32.mxu1 %vm659_vm1, %v657_v3  ;;  %s538_s30 = sshll.u32 %s838_s0, 4  ;;  %s78_s19 = scalar_lea.vmem %s834_s12, %s838_s0 }
   0xb   :  { %570 = vmatmul.mubr.msk.f32.vlgmr.msra.gmra.mrb[2].mxu0 %vm159_vm2, %v233_v14  ;;  %595 = vmatprep.subr.bf16.mxu0 %v658_v4  ;;  %s73_s5 = scalar_lea.vmem %s833_s11, %s538_s30  ;;  %v536_v33 = vld [vmem:[%s78_s19] ss:$0 sm:$0xff]  ;;  %s498_s7 = sshll.u32 %s660_s10, 4  ;;  %s499_s7 = int_to_ptr.vmem [resolvable:$true] %s498_s7 }
   0xc   :  { %583 = vmatprep.mubr.msk.f32.mxu0 %vm659_vm1, %v657_v3  ;;  %v396_v16 = vld [vmem:[%s73_s5] sm:$0xff]  ;;  %v397_v17 = vld [vmem:[%s73_s5 + $0x8] sm:$0xff]  ;;  %s609_s0 = scalar_lea.vmem %s499_s7, 128  ;;  %p614_p2 = scmp.lt.s32.totalorder %s499_s7, %s499_s7 }
   0xd   :  { %577 = vmatmul.mubr.msk.f32.vlgmr.msra.gmra.mrb[2].mxu1 %vm159_vm2, %v310_v15  ;;  %v596_v18 = vpack.c.bf16 %v397_v17, %v396_v16  ;;  %p610_p1 = scmp.ne.s32.totalorder %s499_s7, %s609_s0  ;;  %p615_p3 = scmp.lt.s32.totalorder %s609_s0, %s609_s0 }
   0xf   :  { %597 = vmatpush3.bf16.msra.mxu0 %v596_v18  ;;  %p616_p4 = por %p615_p3, %p614_p2 }
  0x11   :  { %p617_p5 = pnand %p616_p4, %p610_p1 }
  0xd7   :  { %v155_v19 = vpop.f32.mrb[0].mxu0 }
  0xd8   :  { %v557_v20 = vpop.f32.mrb[1].mxu0 }
  0xdc   :  { %v229_v21 = vpop.f32.mrb[0].mxu1 }
  0xdd   :  { %v230_v22 = vadd.f32 %v229_v21, %v155_v19  ;;  %v564_v23 = vpop.f32.mrb[1].mxu1 }
  0xde   :  { %v305_v24 = vpop.f32.mrb[2].mxu0 }
  0xdf   :  { %v309_v25 = vadd.f32 %v305_v24, %v230_v22  ;;  %v571_v26 = vpop.f32.mrb[3].mxu0 }
  0xe0   :  { %v382_v27 = vpop.f32.mrb[2].mxu1 }
  0xe1   :  { %v386_v29 = vadd.f32 %v382_v27, %v309_v25  ;;  %v578_v30 = vpop.f32.mrb[3].mxu1 }
  0xe3   :  { %v394_v31 = vadd.f32 %v535_v28, %v386_v29 }
  0xe5   :  { %603 = vtanh.f32 %v394_v31 }
  0xef   :  { %v604_v32 = vpop.eup %603 }
  0xf0   :  { %490 = vst.msk [vmem:[#allocation5] sm:$0xff] %vm159_vm2, %v604_v32  ;;  %584 = vmatmul.mubr.msk.f32.vlgmr.msra.gmra.mrb[4].mxu0 %vm159_vm2, %v604_v32 }
 0x1c3   :  { %v474_v34 = vpop.f32.mrb[4].mxu0 }
 0x1c4   :  { %v475_v35 = vadd.f32 %v536_v33, %v474_v34  ;;  %v585_v36 = vpop.f32.mrb[5].mxu0 }
 0x1c6   :  { %v479_v37 = vsel %vm478_vm3, %v475_v35, -inf }
 0x1c7   :  { %480 = vmax.xlane.f32.xlu0 %v479_v37 }
 0x254   :  { %v481_v38 = vpop.xlane.xlu0 %480 }
 0x255   :  { %v482_v39 = vsub.f32 %v475_v35, %v481_v38 }
 0x257   :  { %v483_v40 = vmul.f32 1.442695, %v482_v39 }
 0x259   :  { %605 = vpow2.f32 %v483_v40 }
 0x263   :  { %v606_v41 = vpop.eup %605 }
 0x264   :  { %v485_v42 = vsel %vm478_vm3, %v606_v41, 0.0 }
 0x265   :  { %486 = vadd.xlane.f32.xlu0 %v485_v42 }
 0x266   :  { %620 = shalt.err (!%p617_p5)
}
 0x267   :  { %s621_s21 = scalar_lea.hbm %s835_s13, 128 }
 0x268   :  { %p622_p6 = scmp.ne.s32.totalorder %s835_s13, %s621_s21  ;;  %p625_p7 = scmp.lt.u32.totalorder %s621_s21, %s835_s13 }
 0x26a   :  { %p627_p8 = pnand %p625_p7, %p622_p6 }
 0x26c   :  { %630 = shalt.err (!%p627_p8)
}
 0x26d   :  { %501 = dma.vmem_to_hbm [thread:$0]  %s499_s7, 128, %s835_s13, [#allocation6]  }
 0x26e   :  { %s661_s8 = smov [#allocation7]  }
 0x26f   :  { %s508_s26 = sshll.u32 %s661_s8, 4  ;;  %s509_s26 = int_to_ptr.vmem [resolvable:$true] %s508_s26 }
 0x270   :  { %s631_s2 = scalar_lea.vmem %s509_s26, 128  ;;  %p636_p10 = scmp.lt.s32.totalorder %s509_s26, %s509_s26 }
 0x271   :  { %p632_p9 = scmp.ne.s32.totalorder %s509_s26, %s631_s2  ;;  %p637_p11 = scmp.lt.s32.totalorder %s631_s2, %s631_s2 }
 0x273   :  { %p638_p12 = por %p637_p11, %p636_p10 }
 0x275   :  { %p639_p13 = pnand %p638_p12, %p632_p9 }
 0x2f2   :  { %v487_v43 = vpop.xlane.xlu0 %486 }
 0x2f3   :  { %607 = vrcp.f32 %v487_v43 }
 0x2fd   :  { %v608_v44 = vpop.eup %607 }
 0x2fe   :  { %v489_v45 = vmul.f32 %v608_v44, %v606_v41 }
 0x300   :  { %491 = vst.msk [vmem:[#allocation7] sm:$0xff] %vm478_vm3, %v489_v45 }
 0x301   :  { %642 = shalt.err (!%p639_p13)
}
 0x302   :  { %s643_s13 = scalar_lea.hbm %s836_s14, 128 }
 0x303   :  { %p644_p0 = scmp.ne.s32.totalorder %s836_s14, %s643_s13  ;;  %p647_p1 = scmp.lt.u32.totalorder %s643_s13, %s836_s14 }
 0x305   :  { %p649_p2 = pnand %p647_p1, %p644_p0 }
 0x307   :  { %652 = shalt.err (!%p649_p2)
}
 0x308   :  { %511 = dma.vmem_to_hbm [thread:$0]  %s509_s26, 128, %s836_s14, [#allocation8]  }
 0x309   :  { %653 = dma.done.wait [#allocation6], 128  }
 0x30a   :  { %654 = vsyncadd [#allocation6], 4294967168 }
 0x30b   :  { %655 = dma.done.wait [#allocation8], 128  }
 0x30c   :  { %656 = vsyncadd [#allocation8], 4294967168 }
 0x30d   :  { %518 = vsyncpa [#allocation6], 1 }
 0x30e   :  { %519 = vsyncpa [#allocation8], 1 }

</bundles_post_ra>
